<compile_context>
chip_gen: v5e
topology: v5e:2x2
jax: 0.10.0
libtpu: 0.0.40
codegen_flags: <defaults>
</compile_context>

<pallas_src>
import jax
import jax.numpy as jnp
from jax.experimental import pallas as pl
from jax.experimental.pallas import tpu as pltpu


def _gelu_tanh(x):
    # tanh-approximate GELU (EUP tanh, VPU muls/adds).
    # TODO(synk): PyTorch nn.GELU defaults to the exact erf form; the tanh
    # approximation deviates by < ~1e-3, inside the test tolerance.
    c = jnp.float32(0.7978845608028654)  # sqrt(2/pi)
    return 0.5 * x * (1.0 + jnp.tanh(c * (x + 0.044715 * (x * x * x))))


def feed_forward_forward(x_bhwc, w1, w_dw, w2, *, tile_h=8):
    """x_bhwc: (B,H,W,C) f32.  w1: (E,C,1,1)  w_dw: (E,1,3,3)  w2: (C,E,1,1)."""
    B, H, W, C = x_bhwc.shape
    E = w1.shape[0]

    # Row-band tiling: TH output rows per grid step (+ 1-row halo top/bottom).
    TH = max(1, min(tile_h, H))
    while H % TH:
        TH -= 1
    HT = H // TH
    G = B * HT
    Wp = W + 2                      # zero-padded width
    Pp = (TH + 2) * Wp              # flat padded pixels per band
    L = TH * Wp                     # flat output slab per band (junk cols stripped later)
    # 3x3 tap shifts reach up to 2*Wp+2 past an output base index -> pad by 2,
    # rounded up to a sublane-friendly multiple of 8.
    PpE = ((Pp + 2 + 7) // 8) * 8

    # ---- plain-JAX layout plumbing (pad, halo bands, flatten, transpose) ----
    xp = jnp.pad(x_bhwc.astype(jnp.float32), ((0, 0), (1, 1), (1, 1), (0, 0)))
    bands = jnp.stack([xp[:, t * TH:t * TH + TH + 2] for t in range(HT)], axis=1)
    flat = bands.reshape(B, HT, Pp, C)
    flat = jnp.pad(flat, ((0, 0), (0, 0), (0, PpE - Pp), (0, 0)))
    # pixels -> lanes, channels -> sublanes; bf16 stream into the kernel.
    x_bands = jnp.transpose(flat, (0, 1, 3, 2)).reshape(G, C, PpE).astype(jnp.bfloat16)

    w1m = w1.reshape(E, C).astype(jnp.bfloat16)      # (E, C)   pointwise 1
    wdm = w_dw.reshape(E, 9).astype(jnp.float32)     # (E, 9)   depthwise taps (f32 VPU)
    w2m = w2.reshape(C, E).astype(jnp.bfloat16)      # (C, E)   pointwise 2

    def kernel(x_ref, w1_ref, wd_ref, w2_ref, o_ref):
        xt = x_ref[0]                                                       # (C, PpE) bf16
        # pointwise conv C->E: one MXU matmul, f32 accumulate.
        h1 = jnp.dot(w1_ref[...], xt, preferred_element_type=jnp.float32)   # (E, PpE) f32
        h1 = _gelu_tanh(h1)
        # depthwise 3x3 (zero padding is already baked into the halo band):
        # 9 lane-shifted static slices of the flat padded slab, f32 VPU FMAs.
        acc = h1[:, 0:L] * wd_ref[:, 0:1]
        for k in range(1, 9):
            kh, kw = divmod(k, 3)
            off = kh * Wp + kw
            acc = acc + h1[:, off:off + L] * wd_ref[:, k:k + 1]
        h2 = _gelu_tanh(acc).astype(jnp.bfloat16)                           # (E, L)
        # pointwise conv E->C: one MXU matmul, lane-dense (width L) store.
        o_ref[0] = jnp.dot(w2_ref[...], h2, preferred_element_type=jnp.float32)

    out_bands = pl.pallas_call(
        kernel,
        out_shape=jax.ShapeDtypeStruct((G, C, L), jnp.float32),
        grid=(G,),
        in_specs=[
            pl.BlockSpec((1, C, PpE), lambda g: (g, 0, 0)),   # pipelined halo band
            pl.BlockSpec((E, C), lambda g: (0, 0)),           # weights stay resident
            pl.BlockSpec((E, 9), lambda g: (0, 0)),
            pl.BlockSpec((C, E), lambda g: (0, 0)),
        ],
        out_specs=pl.BlockSpec((1, C, L), lambda g: (g, 0, 0)),
        compiler_params=pltpu.CompilerParams(
            dimension_semantics=("parallel",)),               # shard bands across v7x's 2 TCs
    )(x_bands, w1m, wdm, w2m)

    # Strip the 2 junk columns per output row and restore (B, H, W, C).
    out = out_bands.reshape(B, HT, C, TH, Wp)[..., :W]
    return jnp.transpose(out, (0, 1, 3, 4, 2)).reshape(B, H, W, C)


# ---------------------------------------------------------------------------
# Pure-JAX f32 reference (exact-erf GELU) for correctness checking.
# ---------------------------------------------------------------------------
def feed_forward_reference(x_bhwc, w1, w_dw, w2):
    x = x_bhwc.astype(jnp.float32)
    B, H, W, C = x.shape
    E = w1.shape[0]
    h = jnp.einsum("bhwc,ec->bhwe", x, w1.reshape(E, C), precision="highest")
    h = jax.nn.gelu(h, approximate=False)
    hp = jnp.pad(h, ((0, 0), (1, 1), (1, 1), (0, 0)))
    dw = w_dw.reshape(E, 3, 3)
    acc = jnp.zeros_like(h)
    for kh in range(3):
        for kw in range(3):
            acc = acc + hp[:, kh:kh + H, kw:kw + W, :] * dw[:, kh, kw]
    acc = jax.nn.gelu(acc, approximate=False)
    return jnp.einsum("bhwe,ce->bhwc", acc, w2.reshape(C, E), precision="highest")


# ---------------------------------------------------------------------------
# Main
# ---------------------------------------------------------------------------
if __name__ == "__main__":
    B, H, W, DIM, MULT = 2, 16, 16, 4, 4   # FeedForward(dim=4, mult=4), x: [b,h,w,c]
    E = DIM * MULT

    key = jax.random.PRNGKey(0)
    kx, k1, kd, k2 = jax.random.split(key, 4)
    x = jax.random.normal(kx, (B, H, W, DIM), jnp.float32)
    # Effective (spectrally-normalized) conv weights, PyTorch OIHW layout.
    w1 = (DIM ** -0.5) * jax.random.normal(k1, (E, DIM, 1, 1), jnp.float32)
    w_dw = (1.0 / 3.0) * jax.random.normal(kd, (E, 1, 3, 3), jnp.float32)
    w2 = (E ** -0.5) * jax.random.normal(k2, (DIM, E, 1, 1), jnp.float32)

    out = jax.block_until_ready(jax.jit(feed_forward_forward)(x, w1, w_dw, w2))
    ref = jax.block_until_ready(feed_forward_reference(x, w1, w_dw, w2))

    assert out.shape == (B, H, W, DIM) and out.dtype == jnp.float32
    err = float(jnp.max(jnp.abs(out - ref)))
    # bf16 MXU operands + tanh-approx GELU vs a full-f32 / exact-erf reference.
    assert err < 5e-2, f"max abs err = {err}"
    print("KERNEL_OK")
</pallas_src>

<mosaic_0001>
module attributes {stable_mosaic.version = 11 : i64} {
  func.func @kernel(%arg0: i32, %arg1: memref<1x4x184xbf16, #tpu.memory_space<vmem>>, %arg2: memref<16x4xbf16, #tpu.memory_space<vmem>>, %arg3: memref<16x9xf32, #tpu.memory_space<vmem>>, %arg4: memref<4x16xbf16, #tpu.memory_space<vmem>>, %arg5: memref<1x4x144xf32, #tpu.memory_space<vmem>>) attributes {dimension_semantics = [#tpu.dimension_semantics<parallel>], iteration_bounds = array<i64: 4>, scalar_prefetch = 0 : i64, scratch_operands = 0 : i64, tpu.core_type = #tpu.core_type<tc>, window_params = [{transform_indices = @transform_0, window_bounds = array<i64: 1, 4, 184>}, {pipeline_mode = #tpu.pipeline_mode<synchronous>, transform_indices = @transform_1, window_bounds = array<i64: 16, 4>}, {pipeline_mode = #tpu.pipeline_mode<synchronous>, transform_indices = @transform_2, window_bounds = array<i64: 16, 9>}, {pipeline_mode = #tpu.pipeline_mode<synchronous>, transform_indices = @transform_3, window_bounds = array<i64: 4, 16>}, {transform_indices = @transform_4, window_bounds = array<i64: 1, 4, 144>}]} {
    %c0 = arith.constant 0 : index
    %c0_0 = arith.constant 0 : index
    %c0_1 = arith.constant 0 : index
    %0 = vector.load %arg1[%c0, %c0_0, %c0_1] : memref<1x4x184xbf16, #tpu.memory_space<vmem>>, vector<1x4x184xbf16>
    %1 = vector.shape_cast %0 : vector<1x4x184xbf16> to vector<4x184xbf16>
    %c0_2 = arith.constant 0 : index
    %c0_3 = arith.constant 0 : index
    %2 = vector.load %arg2[%c0_2, %c0_3] : memref<16x4xbf16, #tpu.memory_space<vmem>>, vector<16x4xbf16>
    %cst = arith.constant dense<0.000000e+00> : vector<16x184xf32>
    %3 = tpu.matmul %2, %1, %cst {dimension_numbers = #tpu.dot_dimension_numbers<[1], [0], [0], [1], [0, 0, 1, 1], [], []>} : vector<16x4xbf16>, vector<4x184xbf16>, vector<16x184xf32> -> vector<16x184xf32>
    %cst_4 = arith.constant 5.000000e-01 : f32
    %4 = vector.broadcast %cst_4 : f32 to vector<16x184xf32>
    %5 = arith.mulf %4, %3 : vector<16x184xf32>
    %6 = arith.mulf %3, %3 : vector<16x184xf32>
    %7 = arith.mulf %6, %3 : vector<16x184xf32>
    %cst_5 = arith.constant 4.471500e-02 : f32
    %8 = vector.broadcast %cst_5 : f32 to vector<16x184xf32>
    %9 = arith.mulf %8, %7 : vector<16x184xf32>
    %10 = arith.addf %3, %9 : vector<16x184xf32>
    %cst_6 = arith.constant 0.797884583 : f32
    %11 = vector.broadcast %cst_6 : f32 to vector<16x184xf32>
    %12 = arith.mulf %11, %10 : vector<16x184xf32>
    %13 = math.tanh %12 : vector<16x184xf32>
    %cst_7 = arith.constant 1.000000e+00 : f32
    %14 = vector.broadcast %cst_7 : f32 to vector<16x184xf32>
    %15 = arith.addf %14, %13 : vector<16x184xf32>
    %16 = arith.mulf %5, %15 : vector<16x184xf32>
    %17 = vector.extract_strided_slice %16 {offsets = [0, 0], sizes = [16, 144], strides = [1, 1]} : vector<16x184xf32> to vector<16x144xf32>
    %c0_8 = arith.constant 0 : index
    %c0_9 = arith.constant 0 : index
    %18 = vector.load %arg3[%c0_8, %c0_9] : memref<16x9xf32, #tpu.memory_space<vmem>>, vector<16x1xf32>
    %19 = vector.broadcast %18 : vector<16x1xf32> to vector<16x144xf32>
    %20 = arith.mulf %17, %19 : vector<16x144xf32>
    %21 = vector.extract_strided_slice %16 {offsets = [0, 1], sizes = [16, 144], strides = [1, 1]} : vector<16x184xf32> to vector<16x144xf32>
    %c0_10 = arith.constant 0 : index
    %c1 = arith.constant 1 : index
    %22 = vector.load %arg3[%c0_10, %c1] : memref<16x9xf32, #tpu.memory_space<vmem>>, vector<16x1xf32>
    %23 = vector.broadcast %22 : vector<16x1xf32> to vector<16x144xf32>
    %24 = arith.mulf %21, %23 : vector<16x144xf32>
    %25 = arith.addf %20, %24 : vector<16x144xf32>
    %26 = vector.extract_strided_slice %16 {offsets = [0, 2], sizes = [16, 144], strides = [1, 1]} : vector<16x184xf32> to vector<16x144xf32>
    %c0_11 = arith.constant 0 : index
    %c2 = arith.constant 2 : index
    %27 = vector.load %arg3[%c0_11, %c2] : memref<16x9xf32, #tpu.memory_space<vmem>>, vector<16x1xf32>
    %28 = vector.broadcast %27 : vector<16x1xf32> to vector<16x144xf32>
    %29 = arith.mulf %26, %28 : vector<16x144xf32>
    %30 = arith.addf %25, %29 : vector<16x144xf32>
    %31 = vector.extract_strided_slice %16 {offsets = [0, 18], sizes = [16, 144], strides = [1, 1]} : vector<16x184xf32> to vector<16x144xf32>
    %c0_12 = arith.constant 0 : index
    %c3 = arith.constant 3 : index
    %32 = vector.load %arg3[%c0_12, %c3] : memref<16x9xf32, #tpu.memory_space<vmem>>, vector<16x1xf32>
    %33 = vector.broadcast %32 : vector<16x1xf32> to vector<16x144xf32>
    %34 = arith.mulf %31, %33 : vector<16x144xf32>
    %35 = arith.addf %30, %34 : vector<16x144xf32>
    %36 = vector.extract_strided_slice %16 {offsets = [0, 19], sizes = [16, 144], strides = [1, 1]} : vector<16x184xf32> to vector<16x144xf32>
    %c0_13 = arith.constant 0 : index
    %c4 = arith.constant 4 : index
    %37 = vector.load %arg3[%c0_13, %c4] : memref<16x9xf32, #tpu.memory_space<vmem>>, vector<16x1xf32>
    %38 = vector.broadcast %37 : vector<16x1xf32> to vector<16x144xf32>
    %39 = arith.mulf %36, %38 : vector<16x144xf32>
    %40 = arith.addf %35, %39 : vector<16x144xf32>
    %41 = vector.extract_strided_slice %16 {offsets = [0, 20], sizes = [16, 144], strides = [1, 1]} : vector<16x184xf32> to vector<16x144xf32>
    %c0_14 = arith.constant 0 : index
    %c5 = arith.constant 5 : index
    %42 = vector.load %arg3[%c0_14, %c5] : memref<16x9xf32, #tpu.memory_space<vmem>>, vector<16x1xf32>
    %43 = vector.broadcast %42 : vector<16x1xf32> to vector<16x144xf32>
    %44 = arith.mulf %41, %43 : vector<16x144xf32>
    %45 = arith.addf %40, %44 : vector<16x144xf32>
    %46 = vector.extract_strided_slice %16 {offsets = [0, 36], sizes = [16, 144], strides = [1, 1]} : vector<16x184xf32> to vector<16x144xf32>
    %c0_15 = arith.constant 0 : index
    %c6 = arith.constant 6 : index
    %47 = vector.load %arg3[%c0_15, %c6] : memref<16x9xf32, #tpu.memory_space<vmem>>, vector<16x1xf32>
    %48 = vector.broadcast %47 : vector<16x1xf32> to vector<16x144xf32>
    %49 = arith.mulf %46, %48 : vector<16x144xf32>
    %50 = arith.addf %45, %49 : vector<16x144xf32>
    %51 = vector.extract_strided_slice %16 {offsets = [0, 37], sizes = [16, 144], strides = [1, 1]} : vector<16x184xf32> to vector<16x144xf32>
    %c0_16 = arith.constant 0 : index
    %c7 = arith.constant 7 : index
    %52 = vector.load %arg3[%c0_16, %c7] : memref<16x9xf32, #tpu.memory_space<vmem>>, vector<16x1xf32>
    %53 = vector.broadcast %52 : vector<16x1xf32> to vector<16x144xf32>
    %54 = arith.mulf %51, %53 : vector<16x144xf32>
    %55 = arith.addf %50, %54 : vector<16x144xf32>
    %56 = vector.extract_strided_slice %16 {offsets = [0, 38], sizes = [16, 144], strides = [1, 1]} : vector<16x184xf32> to vector<16x144xf32>
    %c0_17 = arith.constant 0 : index
    %c8 = arith.constant 8 : index
    %57 = vector.load %arg3[%c0_17, %c8] : memref<16x9xf32, #tpu.memory_space<vmem>>, vector<16x1xf32>
    %58 = vector.broadcast %57 : vector<16x1xf32> to vector<16x144xf32>
    %59 = arith.mulf %56, %58 : vector<16x144xf32>
    %60 = arith.addf %55, %59 : vector<16x144xf32>
    %cst_18 = arith.constant 5.000000e-01 : f32
    %61 = vector.broadcast %cst_18 : f32 to vector<16x144xf32>
    %62 = arith.mulf %61, %60 : vector<16x144xf32>
    %63 = arith.mulf %60, %60 : vector<16x144xf32>
    %64 = arith.mulf %63, %60 : vector<16x144xf32>
    %cst_19 = arith.constant 4.471500e-02 : f32
    %65 = vector.broadcast %cst_19 : f32 to vector<16x144xf32>
    %66 = arith.mulf %65, %64 : vector<16x144xf32>
    %67 = arith.addf %60, %66 : vector<16x144xf32>
    %cst_20 = arith.constant 0.797884583 : f32
    %68 = vector.broadcast %cst_20 : f32 to vector<16x144xf32>
    %69 = arith.mulf %68, %67 : vector<16x144xf32>
    %70 = math.tanh %69 : vector<16x144xf32>
    %cst_21 = arith.constant 1.000000e+00 : f32
    %71 = vector.broadcast %cst_21 : f32 to vector<16x144xf32>
    %72 = arith.addf %71, %70 : vector<16x144xf32>
    %73 = arith.mulf %62, %72 : vector<16x144xf32>
    %74 = arith.truncf %73 : vector<16x144xf32> to vector<16x144xbf16>
    %c0_22 = arith.constant 0 : index
    %c0_23 = arith.constant 0 : index
    %75 = vector.load %arg4[%c0_22, %c0_23] : memref<4x16xbf16, #tpu.memory_space<vmem>>, vector<4x16xbf16>
    %cst_24 = arith.constant dense<0.000000e+00> : vector<4x144xf32>
    %76 = tpu.matmul %75, %74, %cst_24 {dimension_numbers = #tpu.dot_dimension_numbers<[1], [0], [0], [1], [0, 0, 1, 1], [], []>} : vector<4x16xbf16>, vector<16x144xbf16>, vector<4x144xf32> -> vector<4x144xf32>
    %c0_25 = arith.constant 0 : index
    %c0_26 = arith.constant 0 : index
    %c0_27 = arith.constant 0 : index
    %77 = vector.load %arg5[%c0_25, %c0_26, %c0_27] : memref<1x4x144xf32, #tpu.memory_space<vmem>>, vector<1x4x144xf32>
    %78 = vector.shape_cast %77 : vector<1x4x144xf32> to vector<4x144xf32>
    %79 = vector.shape_cast %76 : vector<4x144xf32> to vector<1x4x144xf32>
    tpu.vector_store %arg5[%c0_25, %c0_26, %c0_27], %79 {strides = array<i32>} : memref<1x4x144xf32, #tpu.memory_space<vmem>>, vector<1x4x144xf32>,
    return
  }
  func.func @transform_0(%arg0: i32) -> (i32, i32, i32) {
    %c0_i32 = arith.constant 0 : i32
    %c0_i32_0 = arith.constant 0 : i32
    %c0_i32_1 = arith.constant 0 : i32
    return %arg0, %c0_i32, %c0_i32_0 : i32, i32, i32
  }
  func.func @transform_1(%arg0: i32) -> (i32, i32) {
    %c0_i32 = arith.constant 0 : i32
    %c0_i32_0 = arith.constant 0 : i32
    %c0_i32_1 = arith.constant 0 : i32
    return %c0_i32, %c0_i32_0 : i32, i32
  }
  func.func @transform_2(%arg0: i32) -> (i32, i32) {
    %c0_i32 = arith.constant 0 : i32
    %c0_i32_0 = arith.constant 0 : i32
    %c0_i32_1 = arith.constant 0 : i32
    return %c0_i32, %c0_i32_0 : i32, i32
  }
  func.func @transform_3(%arg0: i32) -> (i32, i32) {
    %c0_i32 = arith.constant 0 : i32
    %c0_i32_0 = arith.constant 0 : i32
    %c0_i32_1 = arith.constant 0 : i32
    return %c0_i32, %c0_i32_0 : i32, i32
  }
  func.func @transform_4(%arg0: i32) -> (i32, i32, i32) {
    %c0_i32 = arith.constant 0 : i32
    %c0_i32_0 = arith.constant 0 : i32
    %c0_i32_1 = arith.constant 0 : i32
    return %arg0, %c0_i32, %c0_i32_0 : i32, i32, i32
  }
}

</mosaic_0001>

<bundles_post_ra>
// kernel: feed_forward_forward.1
= control target key start
LH: loop header
LB: loop body
LE: loop exit
PB: predicated region body
PF: predicated region fallthrough
CT: control target
= control target key end

     0   :  { %s842_s15 = smov 0   ;;  %s993_s0 = inlined_call_operand.vmem [shape: bf16[4,4,184], index: 0, kind: input, shape index: {}]   ;;  %s994_s1 = inlined_call_operand.vmem [shape: bf16[16,4], index: 1, kind: input, shape index: {}]   ;;  %s995_s2 = inlined_call_operand.vmem [shape: f32[16,9], index: 2, kind: input, shape index: {}]   ;;  %s996_s3 = inlined_call_operand.vmem [shape: bf16[4,16], index: 3, kind: input, shape index: {}]   ;;  %s997_s4 = inlined_call_operand.vmem [shape: f32[4,4,144], index: 4, kind: output, shape index: {}]  }
   0x1 LB: > { %s713_s16 = sadd.s32 4294967295, %s798_s15   ;;  %p717_p0 = scmp.ge.s32.totalorder %s798_s15, 1  ;;  %s798_s15 = sphi %s842_s15, %s14_s15  }
   0x2   : > { %p162_p1 = scmp.lt.s32.totalorder %s798_s15, 5 }
   0x4   : > { %p163_p2 = pnand %p717_p0, %p162_p1 }
   0x5   : > { %p188_p3 = scmp.lt.s32.totalorder (!%p163_p2), %s713_s16, 3  ;;  %s809_s27 = smov (!%p163_p2), 110  }
   0x6   : > { %166 = sbr.rel (%p163_p2) target bundleno = 541 (0x21d), region = 36  ;;  %s810_s28 = smov (!%p163_p2), 127  }
   0x7   : > { %s811_s29 = smov (!%p163_p2), 109   ;;  %s812_s30 = smov (!%p163_p2), 126  }
   0x8   : > { %s813_s5 = smov (!%p163_p2), 92   ;;  %s814_s6 = smov (!%p163_p2), 91  }
   0x9   : > { %s815_s7 = smov (!%p163_p2), 108   ;;  %s816_s8 = smov (!%p163_p2), 90  }
   0xb   : > { %v284_v0 = vld [vmem:[%s995_s2] sm:$0xff]  ;;  %v800_v1 = vmov 2   ;;  %v801_v2 = vmov 1   ;;  %s999_s16 = smov (!%p188_p3, %s713_s16), 3  ;;  %v802_v3 = vmov 3   ;;  %v285_v5 = vld [vmem:[%s995_s2 + $0x8] sm:$0xff] }
   0xc   : > { %761 = vset.pattern.permute.xlu1 %v800_v1  ;;  %760 = vset.pattern.permute.xlu0 %v801_v2  ;;  %s732_s19 = sshll.u32 %s999_s16, 2  ;;  %vm215_vm0 = vcmask 1041408   ;;  %v734_v10 = vld [vmem:[%s994_s1] sm:$0xff]  ;;  %vm211_vm1 = vcmask 31744   ;;  %v803_v11 = vmov 4   ;;  %v804_v12 = vmov 5  }
   0xd   : > { %336 = vperm.xlu1 %761, %v284_v0   ;;  %301 = vperm.xlu0 %760, %v284_v0   ;;  %s192_s22 = scalar_lea.vmem %s993_s0, %s732_s19  ;;  %v805_v13 = vmov 6   ;;  %v806_v14 = vmov 7   ;;  %v807_v15 = vmov 0   ;;  %v808_v16 = vmov 8   ;;  %s733_s11 = sshll.u32 %s999_s16, 3 }
   0xe   : > { %762 = vset.pattern.permute.xlu2 %v802_v3  ;;  %v199_v4 = vld [vmem:[%s192_s22] sm:$0xf]  ;;  %vm324_vm2 = vcmask 1039360   ;;  %vm359_vm3 = vcmask 1031168   ;;  %vm394_vm4 = vcmask 900096   ;;  %vm429_vm5 = vcmask 891904   ;;  %s197_s14 = scalar_lea.vmem %s997_s4, %s733_s11 }
   0xf   : > { %371 = vperm.xlu2 %762, %v284_v0   ;;  %208 = vst [vmem:[#allocation1] ss:$4 sm:$0xff] %v199_v4  ;;  %vm464_vm6 = vcmask 883712   ;;  %vm499_vm7 = vcmask 752640   ;;  %vm534_vm8 = vcmask 744448   ;;  %vm569_vm9 = vcmask 736256  }
  0x10   : > { %vm619_vm10 = vcmask 130048   ;;  %vm652_vm11 = vcmask 1043456   ;;  %vm655_vm12 = vcmask 130052  }
  0x11   : > { %vm656_vm13 = vmor %vm655_vm12, %vm652_vm11 }
  0x15   : > { %340 = vperm.xlu1 %761, %v285_v5   ;;  %305 = vperm.xlu0 %760, %v285_v5  }
  0x16   : > { %v209_v6 = vld.sshfl [vmem:[#allocation1] sm:$0xff pattern:$0x73625140]  ;;  %v210_v7 = vld.sshfl [vmem:[#allocation1 + $0x8] sm:$0xff pattern:$0x73625140] }
  0x17   : > { %375 = vperm.xlu2 %762, %v285_v5   ;;  %v216_v8 = vsel %vm215_vm0, %v209_v6, 0  ;;  %v218_v9 = vsel %vm215_vm0, %v210_v7, 0 }
  0x18   : > { %227 = vmatpush.bf16.msra.mxu0 %v216_v8  ;;  %241 = vmatpush.bf16.msra.mxu1 %v218_v9 }
  0x1b   : > { %726 = vmatmul.msk.bf16.vlgmr.msra.gmra.mxu0 %vm211_vm1, %v734_v10  ;;  %727 = vmatmul.msk.bf16.vlgmr.msra.gmra.mxu1 %vm211_vm1, %v734_v10 }
  0x1d   : > { %764 = vset.pattern.permute.xlu1 %v803_v11  ;;  %763 = vset.pattern.permute.xlu0 %v803_v11 }
  0x1e   : > { %410 = vperm.xlu1 %764, %v285_v5   ;;  %406 = vperm.xlu0 %763, %v284_v0  }
  0x1f   : > { %765 = vset.pattern.permute.xlu2 %v804_v12 }
  0x20   : > { %441 = vperm.xlu2 %765, %v284_v0  }
  0x26   : > { %766 = vset.pattern.permute.xlu1 %v804_v12  ;;  %768 = vset.pattern.permute.xlu0 %v805_v13 }
  0x27   : > { %445 = vperm.xlu1 %766, %v285_v5   ;;  %480 = vperm.xlu0 %768, %v285_v5  }
  0x28   : > { %767 = vset.pattern.permute.xlu2 %v805_v13 }
  0x29   : > { %476 = vperm.xlu2 %767, %v284_v0  }
  0x2f   : > { %769 = vset.pattern.permute.xlu1 %v806_v14  ;;  %773 = vset.pattern.permute.xlu0 %v807_v15 }
  0x30   : > { %511 = vperm.xlu1 %769, %v284_v0   ;;  %288 = vperm.xlu0 %773, %v284_v0  }
  0x31   : > { %770 = vset.pattern.permute.xlu2 %v806_v14 }
  0x32   : > { %515 = vperm.xlu2 %770, %v285_v5  }
  0x38   : > { %771 = vset.pattern.permute.xlu1 %v808_v16  ;;  %775 = vset.pattern.permute.xlu0 %v808_v16 }
  0x39   : > { %546 = vperm.xlu1 %771, %v284_v0  }
  0x3a   : > { %772 = vset.pattern.permute.xlu2 %v808_v16 }
  0x3b   : > { %550 = vperm.xlu2 %772, %v285_v5  }
  0x41   : > { %774 = vset.pattern.permute.xlu1 %v807_v15 }
  0x42   : > { %293 = vperm.xlu1 %774, %v285_v5  }
  0x69   : > { %v372_v33 = vpop.permute.xlu2 %371 }
  0x71   : > { %v871_v43 = vpop.permute.xlu2 %375 }
  0x7a   : > { %v442_v58 = vpop.permute.xlu2 %441 }
  0x7f   : > { %v302_v17 = vpop.permute.xlu0 %301  ;;  %v337_v30 = vpop.permute.xlu1 %336 }
  0x83   : > { %v477_v4 = vpop.permute.xlu2 %476 }
  0x87   : > { %v865_v18 = vpop.permute.xlu0 %305  ;;  %v869_v38 = vpop.permute.xlu1 %340 }
  0x90   : > { %v407_v23 = vpop.permute.xlu0 %406  ;;  %v888_v55 = vpop.permute.xlu1 %410 }
  0x98   : > { %v229_v19 = vpop.f32.mrf.mxu0  ;;  %v243_v20 = vpop.f32.mrf.mxu1 }
  0x99   : > { %v252_v21 = vmul.f32 %v229_v19, %v229_v19  ;;  %v253_v22 = vmul.f32 %v243_v20, %v243_v20  ;;  %v867_v34 = vpop.permute.xlu0 %480  ;;  %v248_v39 = vmul.f32 0.5, %v229_v19  ;;  %v249_v41 = vmul.f32 0.5, %v243_v20  ;;  %v446_v2 = vpop.permute.xlu1 %445 }
  0x9b   : > { %v256_v24 = vmul.f32 %v252_v21, %v229_v19  ;;  %v257_v25 = vmul.f32 %v253_v22, %v243_v20 }
  0x9d   : > { %v260_v26 = vmul.f32 0.044715, %v256_v24  ;;  %v261_v27 = vmul.f32 0.044715, %v257_v25 }
  0x9f   : > { %v264_v28 = vadd.f32 %v260_v26, %v229_v19  ;;  %v265_v29 = vadd.f32 %v261_v27, %v243_v20 }
  0xa0   : > { %v245_v36 = vpop.f32.mrf.mxu1  ;;  %v231_v51 = vpop.f32.mrf.mxu0 }
  0xa1   : > { %v268_v31 = vmul.f32 0.7978846, %v264_v28  ;;  %v269_v32 = vmul.f32 0.7978846, %v265_v29  ;;  %v255_v45 = vmul.f32 %v245_v36, %v245_v36  ;;  %v254_v56 = vmul.f32 %v231_v51, %v231_v51 }
  0xa2   : > { %v289_v47 = vpop.permute.xlu0 %288  ;;  %v512_v10 = vpop.permute.xlu1 %511  ;;  %v251_v15 = vmul.f32 0.5, %v245_v36 }
  0xa3   : > { %776 = vtanh.f32 %v268_v31  ;;  %v259_v48 = vmul.f32 %v255_v45, %v245_v36  ;;  %v258_v59 = vmul.f32 %v254_v56, %v231_v51 }
  0xa4   : > { %778 = vtanh.f32 %v269_v32 }
  0xa5   : > { %v263_v57 = vmul.f32 0.044715, %v259_v48  ;;  %v262_v0 = vmul.f32 0.044715, %v258_v59 }
  0xa7   : > { %v267_v60 = vadd.f32 %v263_v57, %v245_v36  ;;  %v266_v3 = vadd.f32 %v262_v0, %v231_v51 }
  0xa9   : > { %v777_v35 = vpop.eup %776  ;;  %v271_v1 = vmul.f32 0.7978846, %v267_v60  ;;  %v270_v8 = vmul.f32 0.7978846, %v266_v3 }
  0xaa   : > { %v779_v37 = vpop.eup %778  ;;  %v276_v40 = vadd.f32 1.0, %v777_v35  ;;  %v516_v35 = vpop.permute.xlu2 %515 }
  0xab   : > { %v277_v42 = vadd.f32 1.0, %v779_v37  ;;  %780 = vtanh.f32 %v271_v1  ;;  %v547_v25 = vpop.permute.xlu1 %546 }
  0xac   : > { %v873_v44 = vmul.f32 %v276_v40, %v248_v39  ;;  %782 = vtanh.f32 %v270_v8 }
  0xad   : > { %v875_v46 = vmul.f32 %v277_v42, %v249_v41 }
  0xae   : > { %v878_v49 = vmul.f32 %v289_v47, %v873_v44  ;;  %v308_v54 = vmul.f32 %v302_v17, %v873_v44  ;;  %v413_v61 = vmul.f32 %v407_v23, %v873_v44  ;;  %v343_v62 = vmul.f32 %v337_v30, %v873_v44 }
  0xaf   : > { %v881_v50 = vmul.f32 %v289_v47, %v875_v46  ;;  %v379_v52 = vmul.f32 %v372_v33, %v875_v46  ;;  %v309_v53 = vmul.f32 %v302_v17, %v875_v46  ;;  %v344_v63 = vmul.f32 %v337_v30, %v875_v46 }
  0xb0   : > { %316 = vrot.lane.b32.xlu2 %v308_v54, %s810_s28  ;;  %v414_v5 = vmul.f32 %v407_v23, %v875_v46  ;;  %v484_v6 = vmul.f32 %v477_v4, %v875_v46  ;;  %v378_v7 = vmul.f32 %v372_v33, %v873_v44  ;;  %v448_v11 = vmul.f32 %v442_v58, %v873_v44 }
  0xb1   : > { %388 = vrot.lane.b32.xlu0 %v379_v52, %s809_s27  ;;  %318 = vrot.lane.b32.xlu1 %v309_v53, %s810_s28  ;;  %v781_v9 = vpop.eup %780  ;;  %v518_v13 = vmul.f32 %v512_v10, %v873_v44  ;;  %v449_v14 = vmul.f32 %v442_v58, %v875_v46  ;;  %v519_v20 = vmul.f32 %v512_v10, %v875_v46  ;;  %v250_v23 = vmul.f32 0.5, %v231_v51 }
  0xb2   : > { %v279_v12 = vadd.f32 1.0, %v781_v9  ;;  %v783_v17 = vpop.eup %782  ;;  %v483_v22 = vmul.f32 %v477_v4, %v873_v44  ;;  %v553_v26 = vmul.f32 %v547_v25, %v873_v44  ;;  %v551_v39 = vpop.permute.xlu2 %550  ;;  %v554_v44 = vmul.f32 %v547_v25, %v875_v46 }
  0xb3   : > { %v278_v19 = vadd.f32 1.0, %v783_v17 }
  0xb4   : > { %v909_v16 = vmul.f32 %v279_v12, %v251_v15  ;;  %v294_v47 = vpop.permute.xlu1 %293 }
  0xb5   : > { %v918_v24 = vmul.f32 %v278_v19, %v250_v23 }
  0xb6   : > { %v311_v21 = vmul.f32 %v865_v18, %v909_v16  ;;  %v346_v29 = vmul.f32 %v869_v38, %v909_v16  ;;  %v416_v30 = vmul.f32 %v888_v55, %v909_v16  ;;  %v381_v31 = vmul.f32 %v871_v43, %v909_v16 }
  0xb7   : > { %v345_v27 = vmul.f32 %v869_v38, %v918_v24  ;;  %v310_v28 = vmul.f32 %v865_v18, %v918_v24  ;;  %v380_v18 = vmul.f32 %v871_v43, %v918_v24  ;;  %v450_v32 = vmul.f32 %v446_v2, %v918_v24 }
  0xb8   : > { %353 = vrot.lane.b32.xlu2 %v344_v63, %s812_s30  ;;  %v415_v33 = vmul.f32 %v888_v55, %v918_v24  ;;  %v521_v36 = vmul.f32 %v516_v35, %v909_v16  ;;  %v451_v37 = vmul.f32 %v446_v2, %v909_v16  ;;  %v486_v38 = vmul.f32 %v867_v34, %v909_v16 }
  0xb9   : > { %421 = vrot.lane.b32.xlu0 %v413_v61, %s811_s29  ;;  %351 = vrot.lane.b32.xlu1 %v343_v62, %s812_s30  ;;  %v485_v40 = vmul.f32 %v867_v34, %v918_v24  ;;  %v555_v41 = vmul.f32 %v551_v39, %v918_v24  ;;  %v520_v42 = vmul.f32 %v516_v35, %v918_v24 }
  0xba   : > { %v556_v43 = vmul.f32 %v551_v39, %v909_v16 }
  0xc0   : > { %386 = vrot.lane.b32.xlu2 %v378_v7, %s809_s27 }
  0xc1   : > { %493 = vrot.lane.b32.xlu0 %v484_v6, %s813_s5  ;;  %423 = vrot.lane.b32.xlu1 %v414_v5, %s811_s29 }
  0xc8   : > { %458 = vrot.lane.b32.xlu2 %v449_v14, %s815_s7 }
  0xc9   : > { %526 = vrot.lane.b32.xlu0 %v518_v13, %s814_s6  ;;  %456 = vrot.lane.b32.xlu1 %v448_v11, %s815_s7 }
  0xd0   : > { %491 = vrot.lane.b32.xlu2 %v483_v22, %s813_s5 }
  0xd1   : > { %322 = vrot.lane.b32.xlu0 %v311_v21, %s810_s28  ;;  %528 = vrot.lane.b32.xlu1 %v519_v20, %s814_s6  ;;  %v299_v21 = vmul.f32 %v294_v47, %v909_v16 }
  0xd8   : > { %320 = vrot.lane.b32.xlu2 %v310_v28, %s810_s28 }
  0xd9   : > { %561 = vrot.lane.b32.xlu1 %v553_v26, %s816_s8  ;;  %355 = vrot.lane.b32.xlu0 %v345_v27, %s812_s30 }
  0xe0   : > { %392 = vrot.lane.b32.xlu2 %v381_v31, %s809_s27 }
  0xe1   : > { %357 = vrot.lane.b32.xlu1 %v346_v29, %s812_s30  ;;  %427 = vrot.lane.b32.xlu0 %v416_v30, %s811_s29 }
  0xe8   : > { %425 = vrot.lane.b32.xlu2 %v415_v33, %s811_s29 }
  0xe9   : > { %390 = vrot.lane.b32.xlu1 %v380_v18, %s809_s27  ;;  %460 = vrot.lane.b32.xlu0 %v450_v32, %s815_s7  ;;  %v298_v32 = vmul.f32 %v294_v47, %v918_v24 }
  0xf0   : > { %497 = vrot.lane.b32.xlu2 %v486_v38, %s813_s5 }
  0xf1   : > { %462 = vrot.lane.b32.xlu1 %v451_v37, %s815_s7  ;;  %532 = vrot.lane.b32.xlu0 %v521_v36, %s814_s6 }
  0xf8   : > { %530 = vrot.lane.b32.xlu2 %v520_v42, %s814_s6 }
  0xf9   : > { %495 = vrot.lane.b32.xlu1 %v485_v40, %s813_s5  ;;  %565 = vrot.lane.b32.xlu0 %v555_v41, %s816_s8 }
 0x100   : > { %563 = vrot.lane.b32.xlu2 %v554_v44, %s816_s8 }
 0x101   : > { %567 = vrot.lane.b32.xlu1 %v556_v43, %s816_s8 }
 0x10a   : > { %v317_v45 = vpop.permute.xlu2 %316 }
 0x112   : > { %v354_v34 = vpop.permute.xlu2 %353 }
 0x11a   : > { %v387_v48 = vpop.permute.xlu2 %386 }
 0x122   : > { %v459_v55 = vpop.permute.xlu2 %458 }
 0x123   : > { %v389_v51 = vpop.permute.xlu0 %388  ;;  %v319_v52 = vpop.permute.xlu1 %318 }
 0x124   : > { %v325_v53 = vsel %vm324_vm2, %v317_v45, %v319_v52  ;;  %v332_v54 = vadd.f32 %v319_v52, %v881_v50  ;;  %v395_v12 = vsel %vm394_vm4, %v387_v48, %v389_v51 }
 0x125   : > { %v331_v56 = vadd.f32 %v325_v53, %v878_v49 }
 0x126   : > { %v367_v50 = vadd.f32 %v354_v34, %v332_v54 }
 0x128   : > { %v402_v11 = vadd.f32 %v389_v51, %v367_v50 }
 0x12a   : > { %v492_v58 = vpop.permute.xlu2 %491 }
 0x12b   : > { %v422_v57 = vpop.permute.xlu0 %421  ;;  %v352_v46 = vpop.permute.xlu1 %351 }
 0x12c   : > { %v360_v7 = vsel %vm359_vm3, %v352_v46, %v354_v34 }
 0x12d   : > { %v366_v8 = vadd.f32 %v360_v7, %v331_v56 }
 0x12f   : > { %v401_v15 = vadd.f32 %v395_v12, %v366_v8 }
 0x132   : > { %v321_v61 = vpop.permute.xlu2 %320 }
 0x133   : > { %v494_v59 = vpop.permute.xlu0 %493  ;;  %v424_v60 = vpop.permute.xlu1 %423 }
 0x134   : > { %v430_v13 = vsel %vm429_vm5, %v422_v57, %v424_v60  ;;  %v437_v14 = vadd.f32 %v424_v60, %v402_v11  ;;  %v500_v26 = vsel %vm499_vm7, %v492_v58, %v494_v59 }
 0x135   : > { %v436_v19 = vadd.f32 %v430_v13, %v401_v15 }
 0x136   : > { %v472_v22 = vadd.f32 %v459_v55, %v437_v14 }
 0x138   : > { %v507_v30 = vadd.f32 %v494_v59, %v472_v22 }
 0x13a   : > { %v393_v0 = vpop.permute.xlu2 %392 }
 0x13b   : > { %v527_v62 = vpop.permute.xlu0 %526  ;;  %v457_v63 = vpop.permute.xlu1 %456 }
 0x13c   : > { %v465_v17 = vsel %vm464_vm6, %v457_v63, %v459_v55 }
 0x13d   : > { %v471_v23 = vadd.f32 %v465_v17, %v436_v19 }
 0x13f   : > { %v506_v33 = vadd.f32 %v500_v26, %v471_v23 }
 0x142   : > { %v426_v3 = vpop.permute.xlu2 %425 }
 0x143   : > { %v323_v1 = vpop.permute.xlu0 %322  ;;  %v529_v2 = vpop.permute.xlu1 %528 }
 0x144   : > { %v334_v25 = vadd.f32 %v323_v1, %v299_v21  ;;  %v326_v29 = vsel %vm324_vm2, %v321_v61, %v323_v1  ;;  %v535_v31 = vsel %vm534_vm8, %v527_v62, %v529_v2  ;;  %v542_v16 = vadd.f32 %v529_v2, %v507_v30 }
 0x145   : > { %v333_v37 = vadd.f32 %v326_v29, %v298_v32  ;;  %v541_v38 = vadd.f32 %v535_v31, %v506_v33 }
 0x14a   : > { %v498_v6 = vpop.permute.xlu2 %497 }
 0x14b   : > { %v562_v4 = vpop.permute.xlu1 %561  ;;  %v356_v5 = vpop.permute.xlu0 %355 }
 0x152   : > { %v531_v10 = vpop.permute.xlu2 %530 }
 0x153   : > { %v358_v49 = vpop.permute.xlu1 %357  ;;  %v428_v9 = vpop.permute.xlu0 %427 }
 0x154   : > { %v369_v18 = vadd.f32 %v358_v49, %v334_v25  ;;  %v361_v35 = vsel %vm359_vm3, %v356_v5, %v358_v49  ;;  %v431_v47 = vsel %vm429_vm5, %v426_v3, %v428_v9 }
 0x155   : > { %v368_v43 = vadd.f32 %v361_v35, %v333_v37 }
 0x156   : > { %v404_v40 = vadd.f32 %v393_v0, %v369_v18 }
 0x158   : > { %v439_v34 = vadd.f32 %v428_v9, %v404_v40 }
 0x15a   : > { %v564_v28 = vpop.permute.xlu2 %563 }
 0x15b   : > { %v391_v20 = vpop.permute.xlu1 %390  ;;  %v461_v27 = vpop.permute.xlu0 %460  ;;  %v570_v36 = vsel %vm569_vm9, %v562_v4, %v564_v28  ;;  %v577_v42 = vadd.f32 %v564_v28, %v542_v16 }
 0x15c   : > { %v396_v41 = vsel %vm394_vm4, %v391_v20, %v393_v0  ;;  %v576_v44 = vadd.f32 %v570_v36, %v541_v38 }
 0x15d   : > { %v403_v45 = vadd.f32 %v396_v41, %v368_v43  ;;  %v585_v48 = vmul.f32 %v577_v42, %v577_v42  ;;  %v581_v28 = vmul.f32 0.5, %v577_v42 }
 0x15e   : > { %v584_v51 = vmul.f32 %v576_v44, %v576_v44  ;;  %v580_v31 = vmul.f32 0.5, %v576_v44 }
 0x15f   : > { %v438_v54 = vadd.f32 %v431_v47, %v403_v45  ;;  %v589_v56 = vmul.f32 %v585_v48, %v577_v42 }
 0x160   : > { %v588_v58 = vmul.f32 %v584_v51, %v576_v44 }
 0x161   : > { %v593_v61 = vmul.f32 0.044715, %v589_v56 }
 0x162   : > { %v592_v62 = vmul.f32 0.044715, %v588_v58 }
 0x163   : > { %v463_v39 = vpop.permute.xlu1 %462  ;;  %v533_v24 = vpop.permute.xlu0 %532  ;;  %v597_v50 = vadd.f32 %v593_v61, %v577_v42 }
 0x164   : > { %v466_v52 = vsel %vm464_vm6, %v461_v27, %v463_v39  ;;  %v474_v53 = vadd.f32 %v463_v39, %v439_v34  ;;  %v536_v63 = vsel %vm534_vm8, %v531_v10, %v533_v24  ;;  %v596_v49 = vadd.f32 %v592_v62, %v576_v44  ;;  %v618_v39 = vld [vmem:[%s996_s3] sm:$0x3] }
 0x165   : > { %v473_v46 = vadd.f32 %v466_v52, %v438_v54  ;;  %v601_v12 = vmul.f32 0.7978846, %v597_v50 }
 0x166   : > { %v509_v59 = vadd.f32 %v498_v6, %v474_v53  ;;  %v600_v13 = vmul.f32 0.7978846, %v596_v49 }
 0x167   : > { %784 = vtanh.f32 %v601_v12 }
 0x168   : > { %v544_v0 = vadd.f32 %v533_v24, %v509_v59  ;;  %786 = vtanh.f32 %v600_v13 }
 0x16b   : > { %v496_v55 = vpop.permute.xlu1 %495  ;;  %v566_v1 = vpop.permute.xlu0 %565 }
 0x16c   : > { %v501_v57 = vsel %vm499_vm7, %v496_v55, %v498_v6 }
 0x16d   : > { %v508_v60 = vadd.f32 %v501_v57, %v473_v46  ;;  %v785_v21 = vpop.eup %784 }
 0x16e   : > { %v787_v22 = vpop.eup %786  ;;  %v609_v23 = vadd.f32 1.0, %v785_v21 }
 0x16f   : > { %v543_v3 = vadd.f32 %v536_v63, %v508_v60  ;;  %v608_v26 = vadd.f32 1.0, %v787_v22 }
 0x170   : > { %v613_v33 = vmul.f32 %v609_v23, %v581_v28 }
 0x171   : > { %v612_v35 = vmul.f32 %v608_v26, %v580_v31 }
 0x173   : > { %v568_v2 = vpop.permute.xlu1 %567 }
 0x174   : > { %v571_v4 = vsel %vm569_vm9, %v566_v1, %v568_v2  ;;  %v579_v5 = vadd.f32 %v568_v2, %v544_v0 }
 0x175   : > { %v578_v7 = vadd.f32 %v571_v4, %v543_v3 }
 0x176   : > { %v587_v8 = vmul.f32 %v579_v5, %v579_v5  ;;  %v583_v29 = vmul.f32 0.5, %v579_v5 }
 0x177   : > { %v586_v9 = vmul.f32 %v578_v7, %v578_v7  ;;  %v582_v18 = vmul.f32 0.5, %v578_v7 }
 0x178   : > { %v591_v11 = vmul.f32 %v587_v8, %v579_v5 }
 0x179   : > { %v590_v6 = vmul.f32 %v586_v9, %v578_v7 }
 0x17a   : > { %v595_v14 = vmul.f32 0.044715, %v591_v11 }
 0x17b   : > { %v594_v15 = vmul.f32 0.044715, %v590_v6 }
 0x17c   : > { %v599_v17 = vadd.f32 %v595_v14, %v579_v5 }
 0x17d   : > { %v598_v10 = vadd.f32 %v594_v15, %v578_v7 }
 0x17e   : > { %v603_v19 = vmul.f32 0.7978846, %v599_v17 }
 0x17f   : > { %v602_v20 = vmul.f32 0.7978846, %v598_v10 }
 0x180   : > { %788 = vtanh.f32 %v603_v19 }
 0x181   : > { %790 = vtanh.f32 %v602_v20 }
 0x186   : > { %v789_v25 = vpop.eup %788 }
 0x187   : > { %v791_v27 = vpop.eup %790  ;;  %v611_v30 = vadd.f32 1.0, %v789_v25 }
 0x188   : > { %v610_v32 = vadd.f32 1.0, %v791_v27 }
 0x189   : > { %v615_v16 = vmul.f32 %v611_v30, %v583_v29 }
 0x18a   : > { %v614_v36 = vmul.f32 %v610_v32, %v582_v18 }
 0x18b   : > { %v617_v37 = vpack.c.bf16 %v615_v16, %v613_v33 }
 0x18c   : > { %v616_v38 = vpack.c.bf16 %v614_v36, %v612_v35 }
 0x18d   : > { %643 = vmatpush.bf16.msra.mxu3 %v617_v37 }
 0x18e   : > { %630 = vmatpush.bf16.msra.mxu2 %v616_v38 }
 0x190   : > { %729 = vmatmul.msk.bf16.vlgmr.msra.gmra.mxu3 %vm619_vm10, %v618_v39 }
 0x191   : > { %728 = vmatmul.msk.bf16.vlgmr.msra.gmra.mxu2 %vm619_vm10, %v618_v39 }
 0x213   : > { %v645_v40 = vpop.f32.mrf.mxu3 }
 0x214   : > { %v651_v41 = vrot.slane %v645_v40, 4  ;;  %v632_v42 = vpop.f32.mrf.mxu2 }
 0x216   : > { %v653_v43 = vsel %vm652_vm11, %v632_v42, %v651_v41 }
 0x217   : > { %657 = vst.msk [vmem:[%s197_s14] sm:$0xff] %vm656_vm13, %v653_v43 }
 0x21b   : > { %v647_v44 = vpop.f32.mrf.mxu3 }
 0x21c   : > { %v634_v45 = vpop.f32.mrf.mxu2 }
 0x21d PF: > { %s14_s15 = sadd.s32 1, %s798_s15  }
 0x21e   : > { %p11_p4 = scmp.ge.s32.totalorder %s14_s15, 6  }
 0x220   :  { %13 = sbr.rel (!%p11_p4) target bundleno = 1 (0x1), region = 66 }

</bundles_post_ra>
